<compile_context>
chip_gen: v6e
topology: v6e:2x2x1
jax: 0.10.0
libtpu: 0.0.40
codegen_flags: <defaults>
</compile_context>

<pallas_src>
import functools

import jax
import jax.numpy as jnp
from jax import lax
from jax.experimental import pallas as pl
from jax.experimental.pallas import tpu as pltpu

EPS = 1e-5


def _round_up(v, m):
    return ((v + m - 1) // m) * m


def _sublayer_connection_kernel(x_ref, gamma_ref, beta_ref, w_ref, b_ref, o_ref,
                                normed_ref, *, d_model, tn):
    # x_ref: (TM, Dp) native dtype    gamma/beta: (1, Dp) f32
    # w_ref: (Dp, TN) bf16            b_ref: (1, TN) f32
    # o_ref: (TM, TN) native dtype    normed_ref: (TM, Dp) bf16 VMEM scratch
    n = pl.program_id(1)
    tm, dp = x_ref.shape

    # --- custom LayerNorm, computed once per token tile (n == 0), stashed for later n tiles ---
    @pl.when(n == 0)
    def _():
        x = x_ref[...].astype(jnp.float32)
        mean = jnp.sum(x, axis=-1, keepdims=True) * (1.0 / d_model)
        xc = x - mean
        if dp != d_model:
            # ragged feature dim only: mask the padded lanes (cheap (1, Dp) row mask)
            lane = lax.broadcasted_iota(jnp.int32, (1, dp), 1)
            xc = jnp.where(lane < d_model, xc, 0.0)
        var_unbiased = jnp.sum(xc * xc, axis=-1, keepdims=True) * (1.0 / (d_model - 1))
        inv = pl.reciprocal(jnp.sqrt(var_unbiased) + EPS, approx=True)   # EUP slot, ~free
        normed = gamma_ref[...] * (xc * inv) + beta_ref[...]            # padded gamma/beta are 0
        normed_ref[...] = normed.astype(jnp.bfloat16)

    # --- sublayer: Linear(d_model, d_model) column slab on the MXU (bf16 operands, f32 acc) ---
    y = jnp.dot(normed_ref[...], w_ref[...],
                preferred_element_type=jnp.float32) + b_ref[...]

    # --- dropout (eval mode -> identity) + residual (slab sliced from the in-VMEM x tile) ---
    # TODO(synk): training-mode dropout would need pltpu.prng_random_bits masking.
    if tn == dp:
        x_res = x_ref[...]
    else:
        col0 = pl.multiple_of(n * tn, 128)
        x_res = x_ref[:, pl.ds(col0, tn)]
    o_ref[...] = (x_res.astype(jnp.float32) + y).astype(o_ref.dtype)


def sublayer_connection(x, gamma, beta, w, b, *, tm_max=1024, tn=None):
    """x: (B, S, D) -> x + Linear(LayerNorm(x)).  (dropout in eval mode == identity)"""
    B, S, D = x.shape
    assert D >= 2, "unbiased std (D-1) needs d_model >= 2"
    T = B * S
    x_bytes = jnp.dtype(x.dtype).itemsize
    Dp = _round_up(D, 128)                       # lane-dense feature axis

    # --- generation-aware VMEM budget ---
    try:
        vmem_cap = int(pltpu.get_tpu_info().vmem_capacity_bytes)   # 128 MiB v5e/v6e, 64 MiB v7x
    except Exception:
        vmem_cap = 64 << 20                      # conservative fallback
    budget = min(int(vmem_cap * 0.85), vmem_cap - (8 << 20))

    # --- weight (N) tiling: resident bf16 weight if it fits, otherwise column tiles ---
    if tn is not None:
        TN = int(tn)
        assert TN % 128 == 0 and Dp % TN == 0
    elif Dp * Dp * 2 <= budget // 2:
        TN = Dp                                  # whole weight resident, single-buffered
    else:
        TN = max(128, ((budget // 2) // (2 * Dp * 2)) // 128 * 128)
        TN = min(TN, Dp)
        while Dp % TN != 0:
            TN -= 128
    num_n = Dp // TN
    w_buffers = 1 if num_n == 1 else 2           # invariant weight -> one buffer; tiled -> overlap DMA
    w_vmem = w_buffers * Dp * TN * 2
    param_vmem = 2 * Dp * 4 + w_buffers * TN * 4

    # --- token (M) tiling sized from the remaining budget ---
    per_row = 2 * Dp * x_bytes + 2 * TN * x_bytes + Dp * 2      # x + out (double-buffered) + scratch
    tm_fit = max(8, (budget - w_vmem - param_vmem) // per_row)
    tm_cand = min(tm_max, tm_fit)
    if _round_up(T, 8) <= tm_cand:
        TM = _round_up(T, 8)                     # whole problem in one token tile, no wasted rows
    elif tm_cand >= 128:
        TM = (tm_cand // 128) * 128              # MXU-friendly tile
    else:
        TM = max(8, (tm_cand // 8) * 8)
    Tp = _round_up(T, TM)

    # --- operands: avoid host-side pad/slice copies in the aligned (common) case ---
    if Dp == D and Tp == T:
        x2 = x.reshape(T, D)                                    # native dtype, zero-copy reshape
        gamma2 = gamma.reshape(1, D).astype(jnp.float32)
        beta2 = beta.reshape(1, D).astype(jnp.float32)
        b2 = b.reshape(1, D).astype(jnp.float32)
        w2 = w.astype(jnp.bfloat16)
        needs_crop = False
    else:
        x2 = jnp.zeros((Tp, Dp), x.dtype).at[:T, :D].set(x.reshape(T, D))
        gamma2 = jnp.zeros((1, Dp), jnp.float32).at[0, :D].set(gamma.astype(jnp.float32))
        beta2 = jnp.zeros((1, Dp), jnp.float32).at[0, :D].set(beta.astype(jnp.float32))
        b2 = jnp.zeros((1, Dp), jnp.float32).at[0, :D].set(b.astype(jnp.float32))
        w2 = jnp.zeros((Dp, Dp), jnp.bfloat16).at[:D, :D].set(w.astype(jnp.bfloat16))
        needs_crop = True

    # --- BlockSpecs: single-buffer all grid-invariant operands ---
    const_mode = pl.Buffered(buffer_count=1)
    x_spec = pl.BlockSpec((TM, Dp), lambda i, n: (i, 0))
    gamma_spec = pl.BlockSpec((1, Dp), lambda i, n: (0, 0), pipeline_mode=const_mode)
    beta_spec = pl.BlockSpec((1, Dp), lambda i, n: (0, 0), pipeline_mode=const_mode)
    if num_n == 1:
        w_spec = pl.BlockSpec((Dp, TN), lambda i, n: (0, n), pipeline_mode=const_mode)
        b_spec = pl.BlockSpec((1, TN), lambda i, n: (0, n), pipeline_mode=const_mode)
    else:
        w_spec = pl.BlockSpec((Dp, TN), lambda i, n: (0, n))
        b_spec = pl.BlockSpec((1, TN), lambda i, n: (0, n))

    vmem_needed = (2 * TM * Dp * x_bytes + 2 * TM * TN * x_bytes + TM * Dp * 2
                   + w_vmem + param_vmem + (2 << 20))
    vmem_limit = int(min(vmem_cap, max(vmem_needed, 32 << 20)))

    cost = pl.CostEstimate(
        flops=2 * Tp * Dp * Dp,
        transcendentals=2 * Tp,
        bytes_accessed=2 * Tp * Dp * x_bytes + Dp * Dp * 2 + 3 * Dp * 4,
    )

    kernel = functools.partial(_sublayer_connection_kernel, d_model=D, tn=TN)

    out = pl.pallas_call(
        kernel,
        out_shape=jax.ShapeDtypeStruct((Tp, Dp), x.dtype),
        grid_spec=pltpu.PrefetchScalarGridSpec(
            num_scalar_prefetch=0,
            grid=(Tp // TM, num_n),
            in_specs=[x_spec, gamma_spec, beta_spec, w_spec, b_spec],
            out_specs=pl.BlockSpec((TM, TN), lambda i, n: (i, n)),
            scratch_shapes=[pltpu.VMEM((TM, Dp), jnp.bfloat16)],   # stashed LayerNorm output
        ),
        compiler_params=pltpu.CompilerParams(
            dimension_semantics=("parallel", "arbitrary"),
            vmem_limit_bytes=vmem_limit,
        ),
        cost_estimate=cost,
    )(x2, gamma2, beta2, w2, b2)

    out = out[:T, :D] if needs_crop else out
    return out.reshape(B, S, D)


if __name__ == "__main__":
    # NOTE: shapes kept small for the correctness check; for perf benchmarking use
    # realistic shapes (tokens >= 8192, D >= 512) and min-over-runs from an xprof trace.
    key = jax.random.PRNGKey(0)

    def ref(xv, gamma, beta, w, b, D):
        mean = jnp.mean(xv, axis=-1, keepdims=True)
        xc = xv - mean
        std = jnp.sqrt(jnp.sum(xc * xc, axis=-1, keepdims=True) / (D - 1))
        normed = gamma * xc / (std + EPS) + beta
        return xv + normed @ w + b

    # --- Test 1: ragged D (lane-padded path), resident single-buffered weight ---
    B, S, D = 2, 8, 32
    k1, k2, k3, key = jax.random.split(key, 4)
    x = jax.random.normal(k1, (B, S, D), dtype=jnp.float32)
    gamma = jnp.ones((D,), jnp.float32)
    beta = jnp.zeros((D,), jnp.float32)
    w = jax.random.normal(k2, (D, D), jnp.float32) * 0.02
    b = jax.random.normal(k3, (D,), jnp.float32) * 0.02
    out = sublayer_connection(x, gamma, beta, w, b)
    jax.block_until_ready(out)
    exp = ref(x, gamma, beta, w, b, D)
    assert out.shape == x.shape
    assert jnp.allclose(out, exp, atol=2e-2, rtol=2e-2), float(jnp.max(jnp.abs(out - exp)))

    # --- Test 2: lane-aligned D (no host pad/slice) with forced N-tiled weight (large-D / v7x path) ---
    B, S, D = 2, 8, 256
    k1, k2, k3, k4, key = jax.random.split(key, 5)
    x = jax.random.normal(k1, (B, S, D), dtype=jnp.float32)
    gamma = 1.0 + 0.1 * jax.random.normal(k2, (D,), jnp.float32)
    beta = 0.1 * jax.random.normal(k3, (D,), jnp.float32)
    w = jax.random.normal(k4, (D, D), jnp.float32) * 0.02
    b = jax.random.normal(k2, (D,), jnp.float32) * 0.02
    out = sublayer_connection(x, gamma, beta, w, b, tn=128)   # Dp=256, TN=128 -> 2 N-tiles
    jax.block_until_ready(out)
    exp = ref(x, gamma, beta, w, b, D)
    assert out.shape == x.shape
    assert jnp.allclose(out, exp, atol=2e-2, rtol=2e-2), float(jnp.max(jnp.abs(out - exp)))

    print("KERNEL_OK")
</pallas_src>

<mosaic_0001>
module attributes {stable_mosaic.version = 11 : i64} {
  func.func @_sublayer_connection_kernel(%arg0: i32, %arg1: i32, %arg2: memref<16x128xf32, #tpu.memory_space<vmem>>, %arg3: memref<1x128xf32, #tpu.memory_space<vmem>>, %arg4: memref<1x128xf32, #tpu.memory_space<vmem>>, %arg5: memref<128x128xbf16, #tpu.memory_space<vmem>>, %arg6: memref<1x128xf32, #tpu.memory_space<vmem>>, %arg7: memref<16x128xf32, #tpu.memory_space<vmem>>, %arg8: memref<16x128xbf16, #tpu.memory_space<vmem>>) attributes {dimension_semantics = [#tpu.dimension_semantics<parallel>, #tpu.dimension_semantics<arbitrary>], iteration_bounds = array<i64: 1, 1>, scalar_prefetch = 0 : i64, scratch_operands = 1 : i64, tpu.core_type = #tpu.core_type<tc>, window_params = [{transform_indices = @transform_0, window_bounds = array<i64: 16, 128>}, {pipeline_mode = #tpu.pipeline_mode<synchronous>, transform_indices = @transform_1, window_bounds = array<i64: 1, 128>}, {pipeline_mode = #tpu.pipeline_mode<synchronous>, transform_indices = @transform_2, window_bounds = array<i64: 1, 128>}, {pipeline_mode = #tpu.pipeline_mode<synchronous>, transform_indices = @transform_3, window_bounds = array<i64: 128, 128>}, {pipeline_mode = #tpu.pipeline_mode<synchronous>, transform_indices = @transform_4, window_bounds = array<i64: 1, 128>}, {transform_indices = @transform_5, window_bounds = array<i64: 16, 128>}]} {
    %c0_i32 = arith.constant 0 : i32
    %0 = arith.cmpi eq, %arg1, %c0_i32 : i32
    %1 = arith.extui %0 : i1 to i32
    %c0_i32_0 = arith.constant 0 : i32
    %2 = arith.cmpi ne, %1, %c0_i32_0 : i32
    scf.if %2 {
      %c0_10 = arith.constant 0 : index
      %c0_11 = arith.constant 0 : index
      %12 = vector.load %arg2[%c0_10, %c0_11] : memref<16x128xf32, #tpu.memory_space<vmem>>, vector<16x128xf32>
      %cst_12 = arith.constant dense<0.000000e+00> : vector<16xf32>
      %13 = vector.multi_reduction <add>, %12, %cst_12 [1] : vector<16x128xf32> to vector<16xf32>
      %14 = vector.shape_cast %13 : vector<16xf32> to vector<16x1xf32>
      %cst_13 = arith.constant 3.125000e-02 : f32
      %15 = vector.broadcast %cst_13 : f32 to vector<16x1xf32>
      %16 = arith.mulf %14, %15 : vector<16x1xf32>
      %17 = vector.broadcast %16 : vector<16x1xf32> to vector<16x128xf32>
      %18 = arith.subf %12, %17 : vector<16x128xf32>
      %19 = tpu.iota {dimensions = array<i32: 1>} : vector<1x128xi32>
      %c32_i32 = arith.constant 32 : i32
      %20 = vector.broadcast %c32_i32 : i32 to vector<1x128xi32>
      %21 = arith.cmpi slt, %19, %20 : vector<1x128xi32>
      %cst_14 = arith.constant 0.000000e+00 : f32
      %22 = vector.shape_cast %21 : vector<1x128xi1> to vector<1x128xi1>
      %23 = vector.broadcast %22 : vector<1x128xi1> to vector<16x128xi1>
      %24 = vector.broadcast %cst_14 : f32 to vector<16x128xf32>
      %25 = arith.select %23, %18, %24 : vector<16x128xi1>, vector<16x128xf32>
      %26 = arith.mulf %25, %25 : vector<16x128xf32>
      %cst_15 = arith.constant dense<0.000000e+00> : vector<16xf32>
      %27 = vector.multi_reduction <add>, %26, %cst_15 [1] : vector<16x128xf32> to vector<16xf32>
      %28 = vector.shape_cast %27 : vector<16xf32> to vector<16x1xf32>
      %cst_16 = arith.constant 0.0322580636 : f32
      %29 = vector.broadcast %cst_16 : f32 to vector<16x1xf32>
      %30 = arith.mulf %28, %29 : vector<16x1xf32>
      %31 = math.sqrt %30 : vector<16x1xf32>
      %cst_17 = arith.constant 9.99999974E-6 : f32
      %32 = vector.broadcast %cst_17 : f32 to vector<16x1xf32>
      %33 = arith.addf %31, %32 : vector<16x1xf32>
      %34 = tpu.reciprocal %33 {approx = true} : vector<16x1xf32> -> vector<16x1xf32>
      %c0_18 = arith.constant 0 : index
      %c0_19 = arith.constant 0 : index
      %35 = vector.load %arg3[%c0_18, %c0_19] : memref<1x128xf32, #tpu.memory_space<vmem>>, vector<1x128xf32>
      %36 = vector.broadcast %34 : vector<16x1xf32> to vector<16x128xf32>
      %37 = arith.mulf %25, %36 : vector<16x128xf32>
      %38 = vector.broadcast %35 : vector<1x128xf32> to vector<16x128xf32>
      %39 = arith.mulf %38, %37 : vector<16x128xf32>
      %c0_20 = arith.constant 0 : index
      %c0_21 = arith.constant 0 : index
      %40 = vector.load %arg4[%c0_20, %c0_21] : memref<1x128xf32, #tpu.memory_space<vmem>>, vector<1x128xf32>
      %41 = vector.broadcast %40 : vector<1x128xf32> to vector<16x128xf32>
      %42 = arith.addf %39, %41 : vector<16x128xf32>
      %43 = arith.truncf %42 : vector<16x128xf32> to vector<16x128xbf16>
      %c0_22 = arith.constant 0 : index
      %c0_23 = arith.constant 0 : index
      %44 = vector.load %arg8[%c0_22, %c0_23] : memref<16x128xbf16, #tpu.memory_space<vmem>>, vector<16x128xbf16>
      tpu.vector_store %arg8[%c0_22, %c0_23], %43 {strides = array<i32>} : memref<16x128xbf16, #tpu.memory_space<vmem>>, vector<16x128xbf16>,
    } else {
    }
    %c0 = arith.constant 0 : index
    %c0_1 = arith.constant 0 : index
    %3 = vector.load %arg8[%c0, %c0_1] : memref<16x128xbf16, #tpu.memory_space<vmem>>, vector<16x128xbf16>
    %c0_2 = arith.constant 0 : index
    %c0_3 = arith.constant 0 : index
    %4 = vector.load %arg5[%c0_2, %c0_3] : memref<128x128xbf16, #tpu.memory_space<vmem>>, vector<128x128xbf16>
    %cst = arith.constant dense<0.000000e+00> : vector<16x128xf32>
    %5 = tpu.matmul %3, %4, %cst {dimension_numbers = #tpu.dot_dimension_numbers<[1], [0], [0], [1], [0, 0, 1, 1], [], []>} : vector<16x128xbf16>, vector<128x128xbf16>, vector<16x128xf32> -> vector<16x128xf32>
    %c0_4 = arith.constant 0 : index
    %c0_5 = arith.constant 0 : index
    %6 = vector.load %arg6[%c0_4, %c0_5] : memref<1x128xf32, #tpu.memory_space<vmem>>, vector<1x128xf32>
    %7 = vector.broadcast %6 : vector<1x128xf32> to vector<16x128xf32>
    %8 = arith.addf %5, %7 : vector<16x128xf32>
    %c0_6 = arith.constant 0 : index
    %c0_7 = arith.constant 0 : index
    %9 = vector.load %arg2[%c0_6, %c0_7] : memref<16x128xf32, #tpu.memory_space<vmem>>, vector<16x128xf32>
    %10 = arith.addf %9, %8 : vector<16x128xf32>
    %c0_8 = arith.constant 0 : index
    %c0_9 = arith.constant 0 : index
    %11 = vector.load %arg7[%c0_8, %c0_9] : memref<16x128xf32, #tpu.memory_space<vmem>>, vector<16x128xf32>
    tpu.vector_store %arg7[%c0_8, %c0_9], %10 {strides = array<i32>} : memref<16x128xf32, #tpu.memory_space<vmem>>, vector<16x128xf32>,
    return
  }
  func.func @transform_0(%arg0: i32, %arg1: i32) -> (i32, i32) {
    %c0_i32 = arith.constant 0 : i32
    %c0_i32_0 = arith.constant 0 : i32
    return %arg0, %c0_i32 : i32, i32
  }
  func.func @transform_1(%arg0: i32, %arg1: i32) -> (i32, i32) {
    %c0_i32 = arith.constant 0 : i32
    %c0_i32_0 = arith.constant 0 : i32
    %c0_i32_1 = arith.constant 0 : i32
    return %c0_i32, %c0_i32_0 : i32, i32
  }
  func.func @transform_2(%arg0: i32, %arg1: i32) -> (i32, i32) {
    %c0_i32 = arith.constant 0 : i32
    %c0_i32_0 = arith.constant 0 : i32
    %c0_i32_1 = arith.constant 0 : i32
    return %c0_i32, %c0_i32_0 : i32, i32
  }
  func.func @transform_3(%arg0: i32, %arg1: i32) -> (i32, i32) {
    %c0_i32 = arith.constant 0 : i32
    %c0_i32_0 = arith.constant 0 : i32
    return %c0_i32, %arg1 : i32, i32
  }
  func.func @transform_4(%arg0: i32, %arg1: i32) -> (i32, i32) {
    %c0_i32 = arith.constant 0 : i32
    %c0_i32_0 = arith.constant 0 : i32
    return %c0_i32, %arg1 : i32, i32
  }
  func.func @transform_5(%arg0: i32, %arg1: i32) -> (i32, i32) {
    %c0_i32 = arith.constant 0 : i32
    return %arg0, %arg1 : i32, i32
  }
}

</mosaic_0001>

<bundles_post_ra>
// kernel: tpu_custom_call.1
= control target key start
LH: loop header
LB: loop body
LE: loop exit
PB: predicated region body
PF: predicated region fallthrough
CT: control target
= control target key end

     0   :  { %10 = vsyncpa [#allocation4], 0  ;;  %s486_s0 = inlined_call_operand.hbm [shape: f32[16,128], index: 0, kind: input, shape index: {}]   ;;  %s487_s1 = inlined_call_operand.vmem [shape: f32[1,128], index: 1, kind: input, shape index: {}]   ;;  %s488_s2 = inlined_call_operand.vmem [shape: f32[1,128], index: 2, kind: input, shape index: {}]   ;;  %s489_s3 = inlined_call_operand.hbm [shape: bf16[128,128], index: 3, kind: input, shape index: {}]   ;;  %s490_s4 = inlined_call_operand.vmem [shape: f32[1,128], index: 4, kind: input, shape index: {}]   ;;  %s491_s5 = inlined_call_operand.hbm [shape: f32[16,128], index: 5, kind: output, shape index: {}]  }
   0x1   :  { %11 = vsyncpa [#allocation7], 0 }
   0x2   :  { %12 = vsyncpa [#allocation5], 0  ;;  %s413_s18 = smov [#allocation3]  }
   0x3   :  { %s18_s19 = sshll.u32 %s413_s18, 4  ;;  %s19_s19 = int_to_ptr.vmem [resolvable:$true] %s18_s19 }
   0x4   :  { %s355_s20 = scalar_lea.vmem %s19_s19, 256  ;;  %p360_p1 = scmp.lt.s32.totalorder %s19_s19, %s19_s19 }
   0x5   :  { %p356_p0 = scmp.ne.s32.totalorder %s19_s19, %s355_s20  ;;  %p361_p2 = scmp.lt.s32.totalorder %s355_s20, %s355_s20 }
   0x7   :  { %p362_p3 = por %p361_p2, %p360_p1 }
   0x9   :  { %p363_p4 = pnand %p362_p3, %p356_p0 }
   0xb   :  { %366 = shalt.err (!%p363_p4)
}
   0xc   :  { %s414_s21 = smov 128   ;;  %s415_s22 = smov 8  }
   0xd   :  { %24 = dma.hbm_to_vmem [thread:$0]  %s486_s0, 256, %s19_s19, [#allocation4], %s414_s21, %s414_s21, %s415_s22  }
   0xe   :  { %s416_s25 = smov [#allocation6]  }
   0xf   :  { %s34_s26 = sshll.u32 %s416_s25, 4  ;;  %s35_s26 = int_to_ptr.vmem [resolvable:$true] %s34_s26 }
  0x10   :  { %s375_s27 = scalar_lea.vmem %s35_s26, 1024  ;;  %p380_p6 = scmp.lt.s32.totalorder %s35_s26, %s35_s26 }
  0x11   :  { %p376_p5 = scmp.ne.s32.totalorder %s35_s26, %s375_s27  ;;  %p381_p7 = scmp.lt.s32.totalorder %s375_s27, %s375_s27 }
  0x13   :  { %p382_p8 = por %p381_p7, %p380_p6 }
  0x15   :  { %p383_p9 = pnand %p382_p8, %p376_p5 }
  0x17   :  { %386 = shalt.err (!%p383_p9)
}
  0x18   :  { %s417_s28 = smov 64   ;;  %s418_s29 = smov 4  }
  0x19   :  { %40 = dma.hbm_to_vmem [thread:$0]  %s489_s3, 1024, %s35_s26, [#allocation7], %s417_s28, %s417_s28, %s418_s29  }
  0x1a   :  { %407 = dma.done.wait [#allocation4], 256  }
  0x1b   :  { %408 = vsyncadd [#allocation4], 4294967040 }
  0x1c   :  { %409 = dma.done.wait [#allocation7], 1024  }
  0x1d   :  { %410 = vsyncadd [#allocation7], 4294966272  ;;  %v461_v0 = vld [vmem:[#allocation3] sm:$0xff]  ;;  %v463_v1 = vld [vmem:[#allocation3 + $0x8] sm:$0xff]  ;;  %v64_v2 = vlaneseq  ;;  %v419_v15 = vmov 0.0   ;;  %vm420_vm1 = vmmov 0  }
  0x1e   :  { %56 = vadd.xlane.f32.xlu0 %v461_v0  ;;  %v330_v14 = vld [vmem:[#allocation6 + $0x38] sm:$0xff]   ;;  %301 = vmatprep.subr.bf16.mxu0 %v419_v15  ;;  %v331_v16 = vld [vmem:[#allocation6 + $0x30] sm:$0xff]   ;;  %v332_v17 = vld [vmem:[#allocation6 + $0x28] sm:$0xff]  }
  0x1f   :  { %v65_v3 = vand.u32 127, %v64_v2  ;;  %302 = vmatpush3.bf16.msra.mxu0 %v330_v14  ;;  %v333_v18 = vld [vmem:[#allocation6 + $0x20] sm:$0xff]   ;;  %v334_v19 = vld [vmem:[#allocation6 + $0x18] sm:$0xff]   ;;  %v335_v20 = vld [vmem:[#allocation6 + $0x10] sm:$0xff]   ;;  %317 = vmatprep.mubr.msk.bf16.mxu0 %vm420_vm1, %v419_v15 }
  0x20   :  { %303 = vmatprep.subr.bf16.mxu0 %v419_v15  ;;  %v336_v21 = vld [vmem:[#allocation6 + $0x8] sm:$0xff]   ;;  %v337_v22 = vld [vmem:[#allocation6] sm:$0xff]  }
  0x21   :  { %vm66_vm0 = vcmp.lt.s32.totalorder %v65_v3, 32  ;;  %v271_v41 = vld [vmem:[%s487_s1] ss:$0 sm:$0xff]  ;;  %s421_s1 = smov [#allocation8]  }
  0x22   :  { %58 = vadd.xlane.f32.xlu0 %v463_v1  ;;  %v272_v45 = vld [vmem:[%s488_s2] ss:$0 sm:$0xff]  ;;  %s258_s11 = sshll.u32 %s421_s1, 4  ;;  %s259_s11 = int_to_ptr.vmem [resolvable:$true] %s258_s11 }
  0x23   :  { %304 = vmatpush3.bf16.msra.mxu0 %v331_v16  ;;  %v275_v51 = vld [vmem:[%s490_s4] ss:$0 sm:$0xff]  ;;  %s387_s2 = scalar_lea.vmem %s259_s11, 256  ;;  %p392_p11 = scmp.lt.s32.totalorder %s259_s11, %s259_s11 }
  0x24   :  { %305 = vmatprep.subr.bf16.mxu0 %v419_v15  ;;  %p388_p10 = scmp.ne.s32.totalorder %s259_s11, %s387_s2  ;;  %p393_p12 = scmp.lt.s32.totalorder %s387_s2, %s387_s2 }
  0x26   :  { %p394_p13 = por %p393_p12, %p392_p11 }
  0x27   :  { %306 = vmatpush3.bf16.msra.mxu0 %v332_v17 }
  0x28   :  { %307 = vmatprep.subr.bf16.mxu0 %v419_v15  ;;  %p395_p0 = pnand %p394_p13, %p388_p10 }
  0x2b   :  { %308 = vmatpush3.bf16.msra.mxu0 %v333_v18 }
  0x2c   :  { %309 = vmatprep.subr.bf16.mxu0 %v419_v15 }
  0x2f   :  { %310 = vmatpush3.bf16.msra.mxu0 %v334_v19 }
  0x30   :  { %311 = vmatprep.subr.bf16.mxu0 %v419_v15 }
  0x33   :  { %312 = vmatpush3.bf16.msra.mxu0 %v335_v20 }
  0x34   :  { %313 = vmatprep.subr.bf16.mxu0 %v419_v15 }
  0x37   :  { %314 = vmatpush3.bf16.msra.mxu0 %v336_v21 }
  0x38   :  { %315 = vmatprep.subr.bf16.mxu0 %v419_v15 }
  0x3b   :  { %316 = vmatpush3.bf16.msra.mxu0 %v337_v22 }
  0xa7   :  { %v57_v4 = vpop.xlane.xlu0 %56 }
  0xa8   :  { %v60_v5 = vmul.f32 0.03125, %v57_v4 }
  0xaa   :  { %v62_v6 = vsub.f32 %v461_v0, %v60_v5 }
  0xab   :  { %v59_v7 = vpop.xlane.xlu0 %58 }
  0xac   :  { %v61_v8 = vmul.f32 0.03125, %v59_v7  ;;  %v69_v9 = vsel %vm66_vm0, %v62_v6, 0.0 }
  0xad   :  { %v71_v10 = vmul.f32 %v69_v9, %v69_v9 }
  0xae   :  { %v63_v11 = vsub.f32 %v463_v1, %v61_v8 }
  0xaf   :  { %73 = vadd.xlane.f32.xlu1 %v71_v10 }
  0xb0   :  { %v70_v12 = vsel %vm66_vm0, %v63_v11, 0.0 }
  0xb1   :  { %v72_v13 = vmul.f32 %v70_v12, %v70_v12 }
  0xb3   :  { %75 = vadd.xlane.f32.xlu1 %v72_v13 }
 0x138   :  { %v74_v23 = vpop.xlane.xlu1 %73 }
 0x139   :  { %v77_v24 = vmul.f32 0.032258064, %v74_v23 }
 0x13b   :  { %339 = vrsqrt.f32 %v77_v24  ;;  %vm81_vm2 = vcmp.eq.f32.partialorder %v77_v24, inf  ;;  %v84_v29 = vand.u32 2147483648, %v77_v24  ;;  %vm83_vm3 = vcmp.eq.f32.partialorder %v77_v24, 0.0 }
 0x13c   :  { %v76_v25 = vpop.xlane.xlu1 %75 }
 0x13d   :  { %v78_v26 = vmul.f32 0.032258064, %v76_v25 }
 0x13f   :  { %341 = vrsqrt.f32 %v78_v26  ;;  %vm88_vm4 = vcmp.eq.f32.partialorder %v78_v26, inf  ;;  %v91_v35 = vand.u32 2147483648, %v78_v26  ;;  %vm90_vm5 = vcmp.eq.f32.partialorder %v78_v26, 0.0 }
 0x148   :  { %v340_v27 = vpop.eup %339 }
 0x149   :  { %v80_v28 = vmul.f32 %v340_v27, %v77_v24 }
 0x14b   :  { %v82_v30 = vsel %vm81_vm2, %v77_v24, %v80_v28 }
 0x14c   :  { %v342_v31 = vpop.eup %341  ;;  %v85_v32 = vsel %vm83_vm3, %v84_v29, %v82_v30 }
 0x14d   :  { %v93_v33 = vadd.f32 1e-05, %v85_v32  ;;  %v87_v34 = vmul.f32 %v342_v31, %v78_v26 }
 0x14f   :  { %343 = vrcp.f32 %v93_v33  ;;  %v89_v36 = vsel %vm88_vm4, %v78_v26, %v87_v34 }
 0x150   :  { %v92_v37 = vsel %vm90_vm5, %v91_v35, %v89_v36 }
 0x151   :  { %v94_v38 = vadd.f32 1e-05, %v92_v37 }
 0x153   :  { %345 = vrcp.f32 %v94_v38 }
 0x15c   :  { %v344_v39 = vpop.eup %343 }
 0x15d   :  { %v98_v40 = vmul.f32 %v344_v39, %v69_v9 }
 0x15f   :  { %v106_v43 = vmul.f32 %v271_v41, %v98_v40 }
 0x160   :  { %v346_v42 = vpop.eup %345 }
 0x161   :  { %v99_v44 = vmul.f32 %v346_v42, %v70_v12  ;;  %v115_v47 = vadd.f32 %v272_v45, %v106_v43 }
 0x163   :  { %v107_v46 = vmul.f32 %v271_v41, %v99_v44 }
 0x165   :  { %v116_v48 = vadd.f32 %v272_v45, %v107_v46 }
 0x167   :  { %v290_v49 = vpack.c.bf16 %v116_v48, %v115_v47 }
 0x169   :  { %291 = vst [vmem:[#allocation2] sm:$0xff] %v290_v49  }
 0x170   :  { %v338_v50 = vld [vmem:[#allocation2] sm:$0xff]  }
 0x171   :  { %318 = vmatmul.mubr.bf16.vlgmr.msra.gmra.mxu0 %v338_v50 }
 0x231   :  { %v240_v52 = vpop.f32.mrf.mxu0 }
 0x232   :  { %v241_v53 = vadd.f32 %v275_v51, %v240_v52 }
 0x233   :  { %v319_v54 = vpop.f32.mrf.mxu0 }
 0x234   :  { %v249_v55 = vadd.f32 %v241_v53, %v461_v0 }
 0x235   :  { %v243_v56 = vpop.f32.mrf.mxu0 }
 0x236   :  { %251 = vst [vmem:[#allocation8] sm:$0xff] %v249_v55  ;;  %v244_v57 = vadd.f32 %v275_v51, %v243_v56 }
 0x237   :  { %v320_v58 = vpop.f32.mrf.mxu0 }
 0x238   :  { %v250_v59 = vadd.f32 %v244_v57, %v463_v1 }
 0x23a   :  { %252 = vst [vmem:[#allocation8 + $0x8] sm:$0xff] %v250_v59 }
 0x23b   :  { %398 = shalt.err (!%p395_p0)
}
 0x23c   :  { %264 = dma.vmem_to_hbm [thread:$0]  %s259_s11, 256, %s491_s5, [#allocation5], %s414_s21, %s414_s21, %s415_s22  }
 0x23d   :  { %411 = dma.done.wait [#allocation5], 256  }
 0x23e   :  { %412 = vsyncadd [#allocation5], 4294967040 }
 0x23f   :  { %268 = vsyncpa [#allocation4], 1 }
 0x240   :  { %269 = vsyncpa [#allocation7], 1 }
 0x241   :  { %270 = vsyncpa [#allocation5], 1 }

</bundles_post_ra>
